<compile_context>
chip_gen: v6e
topology: v6e:2x2x1
jax: 0.10.0
libtpu: 0.0.40
codegen_flags: <defaults>
</compile_context>

<pallas_src>
import jax
import jax.numpy as jnp
from jax.experimental import pallas as pl
from jax.experimental.pallas import tpu as pltpu


def _round_up(x, m):
    return (x + m - 1) // m * m


def _pick_tm(n):
    """Batch-row tile.  Multiple of 128 rows (full sublanes); >=2 grid steps whenever
    n > 128 so dimension_semantics=("parallel",) actually splits work across the two
    v7x TensorCores; 1024 rows for large batches to amortize the ~0.35us/step overhead
    while double-buffered f32 input tiles still fit v5e's 16 MiB default scoped VMEM."""
    if n >= 2048:
        return 1024
    tm = _round_up(max(n, 1), 128)
    if tm >= 256:           # guarantee at least 2 grid steps
        tm = _round_up(tm // 2, 128)
    return tm


def mlp_kernel(x_ref, w1_ref, b1_ref, w2_ref, b2_ref, w3_ref, b3_ref, o_ref):
    # x arrives as f32 from HBM; cast to bf16 on the VPU (free -- kernel is HBM-bound).
    x = x_ref[...].astype(jnp.bfloat16)
    # linear1 + relu : (TM, 784)bf16 @ (784, H1)bf16 -> f32 accumulate
    h1 = jnp.dot(x, w1_ref[...], preferred_element_type=jnp.float32)
    h1 = jnp.maximum(h1 + b1_ref[...], 0.0)
    # linear2 + relu
    h2 = jnp.dot(h1.astype(jnp.bfloat16), w2_ref[...],
                 preferred_element_type=jnp.float32)
    h2 = jnp.maximum(h2 + b2_ref[...], 0.0)
    # linear3 (no activation): f32 bias add, then bf16 lane-dense (128-wide) store
    out = jnp.dot(h2.astype(jnp.bfloat16), w3_ref[...],
                  preferred_element_type=jnp.float32)
    o_ref[...] = (out + b3_ref[...]).astype(o_ref.dtype)


@jax.jit
def neural_net_forward(x_nchw, params):
    """Forward pass of NeuralNet. x_nchw: (N, 1, 28, 28) float32. Returns (N, 10) f32."""
    w1, b1, w2, b2, w3, b3 = params
    n = x_nchw.shape[0]
    in_size = w1.shape[0]            # 784
    h1_size = w1.shape[1]            # 128
    h2_size = w2.shape[1]            # 64
    out_size = w3.shape[1]           # 10

    x2d = x_nchw.reshape(n, in_size)  # same semantics as torch x.view(-1, 28*28)

    # Weights are tiny (~110K params) and stay VMEM-resident: bf16 for the MXU path,
    # biases stay f32.
    w1_lp = w1.astype(jnp.bfloat16)
    w2_lp = w2.astype(jnp.bfloat16)
    out_pad = _round_up(out_size, 128)     # lane-dense output width
    w3_lp = jnp.pad(w3, ((0, 0), (0, out_pad - out_size))).astype(jnp.bfloat16)
    b3_p = jnp.pad(b3, ((0, 0), (0, out_pad - out_size)))

    if n < 128:
        # Tiny-batch fallback: a padded 128-row Pallas tile would be >98% wasted DMA
        # plus launch overhead; plain XLA dots are faster.  Same bf16-operand math.
        a = jnp.maximum(
            jnp.dot(x2d.astype(jnp.bfloat16), w1_lp,
                    preferred_element_type=jnp.float32) + b1, 0.0)
        a = jnp.maximum(
            jnp.dot(a.astype(jnp.bfloat16), w2_lp,
                    preferred_element_type=jnp.float32) + b2, 0.0)
        out = jnp.dot(a.astype(jnp.bfloat16), w3.astype(jnp.bfloat16),
                      preferred_element_type=jnp.float32) + b3
        return out

    tm = _pick_tm(n)
    grid = (pl.cdiv(n, tm),)          # ragged last block is masked by Pallas (no pad copy)
    const = lambda i: (0, 0)          # weights / biases stay resident across the grid

    flops = 2 * n * (in_size * h1_size + h1_size * h2_size + h2_size * out_pad)
    bytes_accessed = (x2d.size * 4                       # f32 x read (in-kernel cast)
                      + (w1_lp.size + w2_lp.size + w3_lp.size) * 2
                      + (b1.size + b2.size + b3_p.size) * 4
                      + n * out_pad * 2)                 # bf16 logits writeback

    f = pl.pallas_call(
        mlp_kernel,
        out_shape=jax.ShapeDtypeStruct((n, out_pad), jnp.bfloat16),
        grid=grid,
        in_specs=[
            pl.BlockSpec((tm, in_size), lambda i: (i, 0)),   # x tile (streamed, f32)
            pl.BlockSpec((in_size, h1_size), const),         # w1 (resident)
            pl.BlockSpec((1, h1_size), const),               # b1
            pl.BlockSpec((h1_size, h2_size), const),         # w2
            pl.BlockSpec((1, h2_size), const),               # b2
            pl.BlockSpec((h2_size, out_pad), const),         # w3 (lane-padded)
            pl.BlockSpec((1, out_pad), const),               # b3 (lane-padded, f32)
        ],
        out_specs=pl.BlockSpec((tm, out_pad), lambda i: (i, 0)),
        compiler_params=pltpu.CompilerParams(
            dimension_semantics=("parallel",)),              # v7x: shard tiles over 2 TCs
        cost_estimate=pl.CostEstimate(
            flops=flops, transcendentals=0, bytes_accessed=bytes_accessed),
    )
    out = f(x2d, w1_lp, b1, w2_lp, b2, w3_lp, b3_p)
    # Slice the 10 real logits and restore the module's f32 output dtype (tiny op).
    return out[:, :out_size].astype(jnp.float32)


def init_params(key, input_size, hidden_size1, hidden_size2, output_size):
    """Deterministic init; weights stored transposed as (in, out), biases as (1, out)."""
    ks = jax.random.split(key, 6)

    def linear(kw, kb, fan_in, fan_out):
        # mimic torch.nn.Linear default init: U(-1/sqrt(fan_in), 1/sqrt(fan_in))
        bound = 1.0 / jnp.sqrt(jnp.float32(fan_in))
        w = jax.random.uniform(kw, (fan_in, fan_out), jnp.float32, -bound, bound)
        b = jax.random.uniform(kb, (1, fan_out), jnp.float32, -bound, bound)
        return w, b

    w1, b1 = linear(ks[0], ks[1], input_size, hidden_size1)
    w2, b2 = linear(ks[2], ks[3], hidden_size1, hidden_size2)
    w3, b3 = linear(ks[4], ks[5], hidden_size2, output_size)
    return (w1, b1, w2, b2, w3, b3)


if __name__ == "__main__":
    input_size = 28 * 28   # fixed by x.view(-1, 28*28)
    hidden_size1 = 128
    hidden_size2 = 64
    output_size = 10

    key = jax.random.PRNGKey(0)
    k_x, k_p = jax.random.split(key)
    params = init_params(k_p, input_size, hidden_size1, hidden_size2, output_size)
    w1, b1, w2, b2, w3, b3 = params

    # pure-JAX reference following the same bf16-operand quantization
    def _q(a):
        return a.astype(jnp.bfloat16).astype(jnp.float32)

    def ref_fwd(x2d):
        r = jnp.maximum(jnp.dot(_q(x2d), _q(w1)) + b1, 0.0)
        r = jnp.maximum(jnp.dot(_q(r), _q(w2)) + b2, 0.0)
        return jnp.dot(_q(r), _q(w3)) + b3

    # --- main path: batch large enough to exercise the Pallas kernel (2 grid tiles) ---
    batch = 256
    x = jax.random.normal(k_x, (batch, 1, 28, 28), jnp.float32)  # NCHW, like torch
    out = neural_net_forward(x, params)
    jax.block_until_ready(out)
    ref = ref_fwd(x.reshape(batch, -1))
    assert out.shape == (batch, output_size)
    assert out.dtype == jnp.float32
    assert jnp.allclose(out, ref, atol=2e-2, rtol=2e-2)

    # --- tiny-batch path (XLA fallback, same math) ---
    x_small = jax.random.normal(k_x, (2, 1, 28, 28), jnp.float32)
    out_small = neural_net_forward(x_small, params)
    jax.block_until_ready(out_small)
    ref_small = ref_fwd(x_small.reshape(2, -1))
    assert out_small.shape == (2, output_size)
    assert jnp.allclose(out_small, ref_small, atol=2e-2, rtol=2e-2)

    print("KERNEL_OK")
</pallas_src>

<mosaic_0001>
module attributes {stable_mosaic.version = 11 : i64} {
  func.func @mlp_kernel(%arg0: i32, %arg1: memref<128x784xf32, #tpu.memory_space<vmem>>, %arg2: memref<784x128xbf16, #tpu.memory_space<vmem>>, %arg3: memref<1x128xf32, #tpu.memory_space<vmem>>, %arg4: memref<128x64xbf16, #tpu.memory_space<vmem>>, %arg5: memref<1x64xf32, #tpu.memory_space<vmem>>, %arg6: memref<64x128xbf16, #tpu.memory_space<vmem>>, %arg7: memref<1x128xf32, #tpu.memory_space<vmem>>, %arg8: memref<128x128xbf16, #tpu.memory_space<vmem>>) attributes {dimension_semantics = [#tpu.dimension_semantics<parallel>], iteration_bounds = array<i64: 2>, scalar_prefetch = 0 : i64, scratch_operands = 0 : i64, tpu.core_type = #tpu.core_type<tc>, window_params = [{transform_indices = @transform_0, window_bounds = array<i64: 128, 784>}, {pipeline_mode = #tpu.pipeline_mode<synchronous>, transform_indices = @transform_1, window_bounds = array<i64: 784, 128>}, {pipeline_mode = #tpu.pipeline_mode<synchronous>, transform_indices = @transform_2, window_bounds = array<i64: 1, 128>}, {pipeline_mode = #tpu.pipeline_mode<synchronous>, transform_indices = @transform_3, window_bounds = array<i64: 128, 64>}, {pipeline_mode = #tpu.pipeline_mode<synchronous>, transform_indices = @transform_4, window_bounds = array<i64: 1, 64>}, {pipeline_mode = #tpu.pipeline_mode<synchronous>, transform_indices = @transform_5, window_bounds = array<i64: 64, 128>}, {pipeline_mode = #tpu.pipeline_mode<synchronous>, transform_indices = @transform_6, window_bounds = array<i64: 1, 128>}, {transform_indices = @transform_7, window_bounds = array<i64: 128, 128>}]} {
    %c0 = arith.constant 0 : index
    %c0_0 = arith.constant 0 : index
    %0 = vector.load %arg1[%c0, %c0_0] : memref<128x784xf32, #tpu.memory_space<vmem>>, vector<128x784xf32>
    %1 = arith.truncf %0 : vector<128x784xf32> to vector<128x784xbf16>
    %c0_1 = arith.constant 0 : index
    %c0_2 = arith.constant 0 : index
    %2 = vector.load %arg2[%c0_1, %c0_2] : memref<784x128xbf16, #tpu.memory_space<vmem>>, vector<784x128xbf16>
    %cst = arith.constant dense<0.000000e+00> : vector<128x128xf32>
    %3 = tpu.matmul %1, %2, %cst {dimension_numbers = #tpu.dot_dimension_numbers<[1], [0], [0], [1], [0, 0, 1, 1], [], []>} : vector<128x784xbf16>, vector<784x128xbf16>, vector<128x128xf32> -> vector<128x128xf32>
    %c0_3 = arith.constant 0 : index
    %c0_4 = arith.constant 0 : index
    %4 = vector.load %arg3[%c0_3, %c0_4] : memref<1x128xf32, #tpu.memory_space<vmem>>, vector<1x128xf32>
    %5 = vector.broadcast %4 : vector<1x128xf32> to vector<128x128xf32>
    %6 = arith.addf %3, %5 : vector<128x128xf32>
    %cst_5 = arith.constant 0.000000e+00 : f32
    %7 = vector.broadcast %cst_5 : f32 to vector<128x128xf32>
    %8 = arith.maximumf %6, %7 : vector<128x128xf32>
    %9 = arith.truncf %8 : vector<128x128xf32> to vector<128x128xbf16>
    %c0_6 = arith.constant 0 : index
    %c0_7 = arith.constant 0 : index
    %10 = vector.load %arg4[%c0_6, %c0_7] : memref<128x64xbf16, #tpu.memory_space<vmem>>, vector<128x64xbf16>
    %cst_8 = arith.constant dense<0.000000e+00> : vector<128x64xf32>
    %11 = tpu.matmul %9, %10, %cst_8 {dimension_numbers = #tpu.dot_dimension_numbers<[1], [0], [0], [1], [0, 0, 1, 1], [], []>} : vector<128x128xbf16>, vector<128x64xbf16>, vector<128x64xf32> -> vector<128x64xf32>
    %c0_9 = arith.constant 0 : index
    %c0_10 = arith.constant 0 : index
    %12 = vector.load %arg5[%c0_9, %c0_10] : memref<1x64xf32, #tpu.memory_space<vmem>>, vector<1x64xf32>
    %13 = vector.broadcast %12 : vector<1x64xf32> to vector<128x64xf32>
    %14 = arith.addf %11, %13 : vector<128x64xf32>
    %cst_11 = arith.constant 0.000000e+00 : f32
    %15 = vector.broadcast %cst_11 : f32 to vector<128x64xf32>
    %16 = arith.maximumf %14, %15 : vector<128x64xf32>
    %17 = arith.truncf %16 : vector<128x64xf32> to vector<128x64xbf16>
    %c0_12 = arith.constant 0 : index
    %c0_13 = arith.constant 0 : index
    %18 = vector.load %arg6[%c0_12, %c0_13] : memref<64x128xbf16, #tpu.memory_space<vmem>>, vector<64x128xbf16>
    %cst_14 = arith.constant dense<0.000000e+00> : vector<128x128xf32>
    %19 = tpu.matmul %17, %18, %cst_14 {dimension_numbers = #tpu.dot_dimension_numbers<[1], [0], [0], [1], [0, 0, 1, 1], [], []>} : vector<128x64xbf16>, vector<64x128xbf16>, vector<128x128xf32> -> vector<128x128xf32>
    %c0_15 = arith.constant 0 : index
    %c0_16 = arith.constant 0 : index
    %20 = vector.load %arg7[%c0_15, %c0_16] : memref<1x128xf32, #tpu.memory_space<vmem>>, vector<1x128xf32>
    %21 = vector.broadcast %20 : vector<1x128xf32> to vector<128x128xf32>
    %22 = arith.addf %19, %21 : vector<128x128xf32>
    %23 = arith.truncf %22 : vector<128x128xf32> to vector<128x128xbf16>
    %c0_17 = arith.constant 0 : index
    %c0_18 = arith.constant 0 : index
    %24 = vector.load %arg8[%c0_17, %c0_18] : memref<128x128xbf16, #tpu.memory_space<vmem>>, vector<128x128xbf16>
    tpu.vector_store %arg8[%c0_17, %c0_18], %23 {strides = array<i32>} : memref<128x128xbf16, #tpu.memory_space<vmem>>, vector<128x128xbf16>,
    return
  }
  func.func @transform_0(%arg0: i32) -> (i32, i32) {
    %c0_i32 = arith.constant 0 : i32
    %c0_i32_0 = arith.constant 0 : i32
    return %arg0, %c0_i32 : i32, i32
  }
  func.func @transform_1(%arg0: i32) -> (i32, i32) {
    %c0_i32 = arith.constant 0 : i32
    %c0_i32_0 = arith.constant 0 : i32
    %c0_i32_1 = arith.constant 0 : i32
    return %c0_i32, %c0_i32_0 : i32, i32
  }
  func.func @transform_2(%arg0: i32) -> (i32, i32) {
    %c0_i32 = arith.constant 0 : i32
    %c0_i32_0 = arith.constant 0 : i32
    %c0_i32_1 = arith.constant 0 : i32
    return %c0_i32, %c0_i32_0 : i32, i32
  }
  func.func @transform_3(%arg0: i32) -> (i32, i32) {
    %c0_i32 = arith.constant 0 : i32
    %c0_i32_0 = arith.constant 0 : i32
    %c0_i32_1 = arith.constant 0 : i32
    return %c0_i32, %c0_i32_0 : i32, i32
  }
  func.func @transform_4(%arg0: i32) -> (i32, i32) {
    %c0_i32 = arith.constant 0 : i32
    %c0_i32_0 = arith.constant 0 : i32
    %c0_i32_1 = arith.constant 0 : i32
    return %c0_i32, %c0_i32_0 : i32, i32
  }
  func.func @transform_5(%arg0: i32) -> (i32, i32) {
    %c0_i32 = arith.constant 0 : i32
    %c0_i32_0 = arith.constant 0 : i32
    %c0_i32_1 = arith.constant 0 : i32
    return %c0_i32, %c0_i32_0 : i32, i32
  }
  func.func @transform_6(%arg0: i32) -> (i32, i32) {
    %c0_i32 = arith.constant 0 : i32
    %c0_i32_0 = arith.constant 0 : i32
    %c0_i32_1 = arith.constant 0 : i32
    return %c0_i32, %c0_i32_0 : i32, i32
  }
  func.func @transform_7(%arg0: i32) -> (i32, i32) {
    %c0_i32 = arith.constant 0 : i32
    %c0_i32_0 = arith.constant 0 : i32
    return %arg0, %c0_i32 : i32, i32
  }
}

</mosaic_0001>

<bundles_post_ra>
// kernel: neural_net_forward.1
= control target key start
LH: loop header
LB: loop body
LE: loop exit
PB: predicated region body
PF: predicated region fallthrough
CT: control target
= control target key end

     0   :  { %s2386_s24 = smov 0   ;;  %s2897_s0 = inlined_call_operand.vmem [shape: f32[256,784], index: 0, kind: input, shape index: {}]   ;;  %s2898_s1 = inlined_call_operand.vmem [shape: bf16[784,128], index: 1, kind: input, shape index: {}]   ;;  %s2899_s2 = inlined_call_operand.vmem [shape: f32[1,128], index: 2, kind: input, shape index: {}]   ;;  %s2900_s3 = inlined_call_operand.vmem [shape: bf16[128,64], index: 3, kind: input, shape index: {}]   ;;  %s2901_s4 = inlined_call_operand.vmem [shape: f32[1,64], index: 4, kind: input, shape index: {}]   ;;  %s2902_s5 = inlined_call_operand.vmem [shape: bf16[64,128], index: 5, kind: input, shape index: {}]   ;;  %s2903_s6 = inlined_call_operand.vmem [shape: f32[1,128], index: 6, kind: input, shape index: {}]   ;;  %s2904_s7 = inlined_call_operand.vmem [shape: bf16[256,128], index: 7, kind: output, shape index: {}]  }
   0x1 LB: > { %s1779_s25 = sadd.s32 4294967295, %s2344_s24   ;;  %p1783_p0 = scmp.ge.s32.totalorder %s2344_s24, 1  ;;  %s2344_s24 = sphi %s2386_s24, %s17_s24  }
   0x2   : > { %p239_p1 = scmp.lt.s32.totalorder %s2344_s24, 3 }
   0x4   : > { %p240_p2 = pnand %p1783_p0, %p239_p1 }
   0x6   : > { %243 = sbr.rel (%p240_p2) target bundleno = 776 (0x308), region = 48 }
   0xb   : > { %v2277_v0 = vld [vmem:[%s2898_s1 + $0x78] sm:$0xff]   ;;  %v2281_v4 = vld [vmem:[%s2898_s1 + $0x70] sm:$0xff]   ;;  %v2285_v8 = vld [vmem:[%s2898_s1 + $0x68] sm:$0xff]   ;;  %s1784_s12 = sshll.u32 %s1779_s25, 4  ;;  %vm853_vm0 = vcmask 130048   ;;  %vm1521_vm1 = vcmask 523264  }
   0xc   : > { %v2278_v1 = vld [vmem:[%s2898_s1 + $0xf8] sm:$0xff]   ;;  %1949 = vmatprep.subr.bf16.mxu0 %v2277_v0  ;;  %v2282_v5 = vld [vmem:[%s2898_s1 + $0xf0] sm:$0xff]   ;;  %v2286_v9 = vld [vmem:[%s2898_s1 + $0xe8] sm:$0xff]   ;;  %p273_p3 = scmp.lt.s32.totalorder %s1784_s12, 31 }
   0xd   : > { %v2279_v2 = vld [vmem:[%s2898_s1 + $0x38] sm:$0xff]   ;;  %2013 = vmatprep.subr.bf16.mxu1 %v2278_v1  ;;  %v2283_v6 = vld [vmem:[%s2898_s1 + $0x30] sm:$0xff]   ;;  %v2287_v10 = vld [vmem:[%s2898_s1 + $0x28] sm:$0xff]  }
   0xe   : > { %v2280_v3 = vld [vmem:[%s2898_s1 + $0xb8] sm:$0xff]   ;;  %1950 = vmatpush3.bf16.msra.mxu0 %v2279_v2  ;;  %v2284_v7 = vld [vmem:[%s2898_s1 + $0xb0] sm:$0xff]   ;;  %v2288_v11 = vld [vmem:[%s2898_s1 + $0xa8] sm:$0xff]   ;;  %s2916_s12 = smov (!%p273_p3, %s1784_s12), 31 }
   0xf   : > { %2014 = vmatpush3.bf16.msra.mxu1 %v2280_v3  ;;  %1951 = vmatprep.subr.bf16.mxu0 %v2281_v4  ;;  %v2289_v12 = vld [vmem:[%s2898_s1 + $0x60] sm:$0xff]   ;;  %v2293_v16 = vld [vmem:[%s2898_s1 + $0x58] sm:$0xff]   ;;  %v2297_v20 = vld [vmem:[%s2898_s1 + $0x50] sm:$0xff]   ;;  %s2268_s14 = smul.u32 56, %s2916_s12  ;;  %s1787_s10 = sshll.u32 %s2916_s12, 2 }
  0x10   : > { %2015 = vmatprep.subr.bf16.mxu1 %v2282_v5  ;;  %v2290_v13 = vld [vmem:[%s2898_s1 + $0xe0] sm:$0xff]   ;;  %v2294_v17 = vld [vmem:[%s2898_s1 + $0xd8] sm:$0xff]   ;;  %v2298_v21 = vld [vmem:[%s2898_s1 + $0xd0] sm:$0xff]  }
  0x11   : > { %v2291_v14 = vld [vmem:[%s2898_s1 + $0x20] sm:$0xff]   ;;  %v2295_v18 = vld [vmem:[%s2898_s1 + $0x18] sm:$0xff]   ;;  %v2299_v22 = vld [vmem:[%s2898_s1 + $0x10] sm:$0xff]   ;;  %s2492_s26 = scalar_lea.vmem %s2897_s0, %s2268_s14  ;;  %s2884_s14 = scalar_lea.vmem %s2904_s7, %s1787_s10 }
  0x12   : > { %1952 = vmatpush3.bf16.msra.mxu0 %v2283_v6  ;;  %v2292_v15 = vld [vmem:[%s2898_s1 + $0xa0] sm:$0xff]   ;;  %v2296_v19 = vld [vmem:[%s2898_s1 + $0x98] sm:$0xff]   ;;  %v2300_v23 = vld [vmem:[%s2898_s1 + $0x90] sm:$0xff]  }
  0x13   : > { %2016 = vmatpush3.bf16.msra.mxu1 %v2284_v7  ;;  %1953 = vmatprep.subr.bf16.mxu0 %v2285_v8  ;;  %v2301_v24 = vld [vmem:[%s2898_s1 + $0x48] sm:$0xff]   ;;  %v2305_v28 = vld [vmem:[%s2898_s1 + $0x40] sm:$0xff]   ;;  %v289_v34 = vld [vmem:[%s2492_s26 + $0x18] sm:$0xff] }
  0x14   : > { %2017 = vmatprep.subr.bf16.mxu1 %v2286_v9  ;;  %v2302_v25 = vld [vmem:[%s2898_s1 + $0xc8] sm:$0xff]   ;;  %v2306_v29 = vld [vmem:[%s2898_s1 + $0xc0] sm:$0xff]   ;;  %v296_v36 = vld [vmem:[%s2492_s26 + $0x50] sm:$0xff] }
  0x15   : > { %v2303_v26 = vld [vmem:[%s2898_s1 + $0x8] sm:$0xff]   ;;  %v2307_v30 = vld [vmem:[%s2898_s1] sm:$0xff]   ;;  %v293_v38 = vld [vmem:[%s2492_s26 + $0x38] sm:$0xff]  ;;  %v401_v39 = vpack.c.bf16 %v296_v36, %v289_v34 }
  0x16   : > { %1954 = vmatpush3.bf16.msra.mxu0 %v2287_v10  ;;  %v2304_v27 = vld [vmem:[%s2898_s1 + $0x88] sm:$0xff]   ;;  %v2308_v31 = vld [vmem:[%s2898_s1 + $0x80] sm:$0xff]   ;;  %v288_v41 = vld [vmem:[%s2492_s26 + $0x10] sm:$0xff] }
  0x17   : > { %2018 = vmatpush3.bf16.msra.mxu1 %v2288_v11  ;;  %1955 = vmatprep.subr.bf16.mxu0 %v2289_v12  ;;  %v287_v32 = vld [vmem:[%s2492_s26 + $0x8] sm:$0xff]  ;;  %v294_v33 = vld [vmem:[%s2492_s26 + $0x40] sm:$0xff]  ;;  %v2309_v44 = vld [vmem:[%s2898_s1 + $0x178] sm:$0xff]  }
  0x18   : > { %2019 = vmatprep.subr.bf16.mxu1 %v2290_v13  ;;  %v399_v35 = vpack.c.bf16 %v294_v33, %v287_v32  ;;  %v286_v37 = vld [vmem:[%s2492_s26] sm:$0xff]  ;;  %v295_v42 = vld [vmem:[%s2492_s26 + $0x48] sm:$0xff]  ;;  %1007 = vmatprep.mubr.bf16.mxu1 %v401_v39  ;;  %v2310_v45 = vld [vmem:[%s2898_s1 + $0x138] sm:$0xff]  }
  0x19   : > { %v398_v40 = vpack.c.bf16 %v293_v38, %v286_v37  ;;  %v400_v43 = vpack.c.bf16 %v295_v42, %v288_v41  ;;  %v301_v46 = vld [vmem:[%s2492_s26 + $0x78] sm:$0xff]  ;;  %v308_v47 = vld [vmem:[%s2492_s26 + $0xb0] sm:$0xff]  ;;  %v303_v48 = vld [vmem:[%s2492_s26 + $0x88] sm:$0xff] }
  0x1a   : > { %1956 = vmatpush3.bf16.msra.mxu0 %v2291_v14  ;;  %910 = vmatprep.mubr.bf16.mxu0 %v399_v35  ;;  %v310_v49 = vld [vmem:[%s2492_s26 + $0xc0] sm:$0xff]  ;;  %v406_v50 = vpack.c.bf16 %v308_v47, %v301_v46  ;;  %v300_v52 = vld [vmem:[%s2492_s26 + $0x70] sm:$0xff]  ;;  %v307_v53 = vld [vmem:[%s2492_s26 + $0xa8] sm:$0xff] }
  0x1b   : > { %2020 = vmatpush3.bf16.msra.mxu1 %v2292_v15  ;;  %1957 = vmatprep.subr.bf16.mxu0 %v2293_v16  ;;  %v408_v51 = vpack.c.bf16 %v310_v49, %v303_v48  ;;  %v302_v54 = vld [vmem:[%s2492_s26 + $0x80] sm:$0xff]  ;;  %v309_v55 = vld [vmem:[%s2492_s26 + $0xb8] sm:$0xff]  ;;  %v405_v56 = vpack.c.bf16 %v307_v53, %v300_v52  ;;  %v2311_v57 = vld [vmem:[%s2898_s1 + $0x170] sm:$0xff]  }
  0x1c   : > { %2021 = vmatprep.subr.bf16.mxu1 %v2294_v17  ;;  %v407_v58 = vpack.c.bf16 %v309_v55, %v302_v54  ;;  %v2312_v59 = vld [vmem:[%s2898_s1 + $0x130] sm:$0xff]   ;;  %v315_v60 = vld [vmem:[%s2492_s26 + $0xe8] sm:$0xff]  ;;  %v322_v61 = vld [vmem:[%s2492_s26 + $0x120] sm:$0xff] }
  0x1d   : > { %v413_v62 = vpack.c.bf16 %v322_v61, %v315_v60  ;;  %v317_v63 = vld [vmem:[%s2492_s26 + $0xf8] sm:$0xff]  ;;  %v324_v0 = vld [vmem:[%s2492_s26 + $0x130] sm:$0xff]  ;;  %v314_v2 = vld [vmem:[%s2492_s26 + $0xe0] sm:$0xff] }
  0x1e   : > { %1958 = vmatpush3.bf16.msra.mxu0 %v2295_v18  ;;  %v415_v1 = vpack.c.bf16 %v324_v0, %v317_v63  ;;  %v321_v3 = vld [vmem:[%s2492_s26 + $0x118] sm:$0xff]  ;;  %v316_v4 = vld [vmem:[%s2492_s26 + $0xf0] sm:$0xff]  ;;  %v2313_v5 = vld [vmem:[%s2898_s1 + $0x168] sm:$0xff]  }
  0x1f   : > { %2022 = vmatpush3.bf16.msra.mxu1 %v2296_v19  ;;  %1959 = vmatprep.subr.bf16.mxu0 %v2297_v20  ;;  %v2314_v6 = vld [vmem:[%s2898_s1 + $0x128] sm:$0xff]   ;;  %v329_v8 = vld [vmem:[%s2492_s26 + $0x158] sm:$0xff]  ;;  %v336_v9 = vld [vmem:[%s2492_s26 + $0x190] sm:$0xff]  ;;  %v412_v12 = vpack.c.bf16 %v321_v3, %v314_v2 }
  0x20   : > { %2023 = vmatprep.subr.bf16.mxu1 %v2298_v21  ;;  %v323_v7 = vld [vmem:[%s2492_s26 + $0x128] sm:$0xff]  ;;  %v338_v11 = vld [vmem:[%s2492_s26 + $0x1a0] sm:$0xff]  ;;  %v420_v14 = vpack.c.bf16 %v336_v9, %v329_v8  ;;  %v328_v18 = vld [vmem:[%s2492_s26 + $0x150] sm:$0xff] }
  0x21   : > { %v331_v10 = vld [vmem:[%s2492_s26 + $0x168] sm:$0xff]  ;;  %v414_v13 = vpack.c.bf16 %v323_v7, %v316_v4  ;;  %v2315_v15 = vld [vmem:[%s2898_s1 + $0x160] sm:$0xff]   ;;  %v337_v21 = vld [vmem:[%s2492_s26 + $0x198] sm:$0xff] }
  0x22   : > { %1960 = vmatpush3.bf16.msra.mxu0 %v2299_v22  ;;  %v422_v16 = vpack.c.bf16 %v338_v11, %v331_v10  ;;  %v2316_v17 = vld [vmem:[%s2898_s1 + $0x120] sm:$0xff]   ;;  %v335_v19 = vld [vmem:[%s2492_s26 + $0x188] sm:$0xff]  ;;  %v2319_v32 = vld [vmem:[%s2898_s1 + $0x150] sm:$0xff]  }
  0x23   : > { %2024 = vmatpush3.bf16.msra.mxu1 %v2300_v23  ;;  %1961 = vmatprep.subr.bf16.mxu0 %v2301_v24  ;;  %v330_v20 = vld [vmem:[%s2492_s26 + $0x160] sm:$0xff]  ;;  %v343_v22 = vld [vmem:[%s2492_s26 + $0x1c8] sm:$0xff]  ;;  %v2317_v24 = vld [vmem:[%s2898_s1 + $0x158] sm:$0xff]  }
  0x24   : > { %2025 = vmatprep.subr.bf16.mxu1 %v2302_v25  ;;  %v350_v23 = vld [vmem:[%s2492_s26 + $0x200] sm:$0xff]  ;;  %v345_v25 = vld [vmem:[%s2492_s26 + $0x1d8] sm:$0xff]  ;;  %v2320_v33 = vld [vmem:[%s2898_s1 + $0x110] sm:$0xff]  }
  0x25   : > { %v342_v34 = vld [vmem:[%s2492_s26 + $0x1c0] sm:$0xff]  ;;  %v349_v35 = vld [vmem:[%s2492_s26 + $0x1f8] sm:$0xff]  ;;  %v344_v36 = vld [vmem:[%s2492_s26 + $0x1d0] sm:$0xff] }
  0x26   : > { %1962 = vmatpush3.bf16.msra.mxu0 %v2303_v26  ;;  %v352_v26 = vld [vmem:[%s2492_s26 + $0x210] sm:$0xff]  ;;  %v351_v37 = vld [vmem:[%s2492_s26 + $0x208] sm:$0xff]  ;;  %v357_v38 = vld [vmem:[%s2492_s26 + $0x238] sm:$0xff] }
  0x27   : > { %2026 = vmatpush3.bf16.msra.mxu1 %v2304_v27  ;;  %1963 = vmatprep.subr.bf16.mxu0 %v2305_v28  ;;  %v2318_v27 = vld [vmem:[%s2898_s1 + $0x118] sm:$0xff]   ;;  %v419_v28 = vpack.c.bf16 %v335_v19, %v328_v18  ;;  %v364_v39 = vld [vmem:[%s2492_s26 + $0x270] sm:$0xff]  ;;  %v366_v41 = vld [vmem:[%s2492_s26 + $0x280] sm:$0xff] }
  0x28   : > { %2027 = vmatprep.subr.bf16.mxu1 %v2306_v29  ;;  %v421_v29 = vpack.c.bf16 %v337_v21, %v330_v20  ;;  %v2321_v42 = vld [vmem:[%s2898_s1 + $0x148] sm:$0xff]   ;;  %v434_v46 = vpack.c.bf16 %v364_v39, %v357_v38  ;;  %v356_v48 = vld [vmem:[%s2492_s26 + $0x230] sm:$0xff]  ;;  %v2323_v49 = vld [vmem:[%s2898_s1 + $0x140] sm:$0xff]  }
  0x29   : > { %v2324_v52 = vld [vmem:[%s2898_s1 + $0x100] sm:$0xff]   ;;  %v365_v53 = vld [vmem:[%s2492_s26 + $0x278] sm:$0xff]  ;;  %v371_v54 = vld [vmem:[%s2492_s26 + $0x2a8] sm:$0xff] }
  0x2a   : > { %1964 = vmatpush3.bf16.msra.mxu0 %v2307_v30  ;;  %v427_v30 = vpack.c.bf16 %v350_v23, %v343_v22  ;;  %v378_v55 = vld [vmem:[%s2492_s26 + $0x2e0] sm:$0xff]  ;;  %v377_v0 = vld [vmem:[%s2492_s26 + $0x2d8] sm:$0xff]  ;;  %v379_v2 = vld [vmem:[%s2492_s26 + $0x2e8] sm:$0xff] }
  0x2b   : > { %2028 = vmatpush3.bf16.msra.mxu1 %v2308_v31  ;;  %2077 = vmatprep.subr.bf16.mxu0 %v2309_v44  ;;  %v429_v31 = vpack.c.bf16 %v352_v26, %v345_v25  ;;  %v441_v60 = vpack.c.bf16 %v378_v55, %v371_v54  ;;  %v370_v63 = vld [vmem:[%s2492_s26 + $0x2a0] sm:$0xff]  ;;  %v385_v3 = vld [vmem:[%s2492_s26 + $0x318] sm:$0xff]  ;;  %v392_v4 = vld [vmem:[%s2492_s26 + $0x350] sm:$0xff] }
  0x2c   : > { %2252 = vmatprep.subr.bf16.mxu1 %v2309_v44  ;;  %v2322_v44 = vld [vmem:[%s2898_s1 + $0x108] sm:$0xff]   ;;  %v440_v7 = vpack.c.bf16 %v377_v0, %v370_v63  ;;  %v448_v9 = vpack.c.bf16 %v392_v4, %v385_v3  ;;  %v384_v11 = vld [vmem:[%s2492_s26 + $0x310] sm:$0xff]  ;;  %v382_v18 = vld [vmem:[%s2492_s26 + $0x300] sm:$0xff] }
  0x2d   : > { %911 = vmatmul.mubr.bf16.vlgmr.msra.gmra.mxu0 %v398_v40  ;;  %v359_v40 = vld [vmem:[%s2492_s26 + $0x248] sm:$0xff]  ;;  %v290_v23 = vld [vmem:[%s2492_s26 + $0x20] sm:$0xff]  ;;  %v381_v26 = vld [vmem:[%s2492_s26 + $0x2f8] sm:$0xff] }
  0x2e   : > { %1008 = vmatmul.mubr.bf16.vlgmr.msra.gmra.mxu1 %v400_v43  ;;  %2078 = vmatpush3.bf16.msra.mxu0 %v2310_v45  ;;  %v426_v43 = vpack.c.bf16 %v349_v35, %v342_v34  ;;  %v436_v47 = vpack.c.bf16 %v366_v41, %v359_v40  ;;  %v374_v25 = vld [vmem:[%s2492_s26 + $0x2c0] sm:$0xff]  ;;  %v304_v35 = vld [vmem:[%s2492_s26 + $0x90] sm:$0xff]  ;;  %v395_v38 = vld [vmem:[%s2492_s26 + $0x368] sm:$0xff] }
  0x2f   : > { %2260 = vmatpush3.bf16.msra.mxu1 %v2310_v45  ;;  %918 = vmatprep.mubr.bf16.mxu0 %v406_v50  ;;  %v428_v45 = vpack.c.bf16 %v351_v37, %v344_v36  ;;  %v363_v50 = vld [vmem:[%s2492_s26 + $0x268] sm:$0xff]  ;;  %v388_v37 = vld [vmem:[%s2492_s26 + $0x330] sm:$0xff]  ;;  %v326_v40 = vld [vmem:[%s2492_s26 + $0x140] sm:$0xff] }
  0x30   : > { %1015 = vmatprep.mubr.bf16.mxu1 %v408_v51  ;;  %2079 = vmatprep.subr.bf16.mxu0 %v2311_v57  ;;  %v358_v51 = vld [vmem:[%s2492_s26 + $0x240] sm:$0xff]  ;;  %v311_v36 = vld [vmem:[%s2492_s26 + $0xc8] sm:$0xff]  ;;  %v292_v41 = vld [vmem:[%s2492_s26 + $0x30] sm:$0xff] }
  0x31   : > { %2253 = vmatprep.subr.bf16.mxu1 %v2311_v57  ;;  %v380_v57 = vld [vmem:[%s2492_s26 + $0x2f0] sm:$0xff]  ;;  %v319_v39 = vld [vmem:[%s2492_s26 + $0x108] sm:$0xff]  ;;  %v354_v0 = vld [vmem:[%s2492_s26 + $0x220] sm:$0xff] }
  0x32   : > { %2080 = vmatpush3.bf16.msra.mxu0 %v2312_v59  ;;  %v327_v54 = vld [vmem:[%s2492_s26 + $0x148] sm:$0xff] }
  0x33   : > { %2261 = vmatpush3.bf16.msra.mxu1 %v2312_v59  ;;  %2081 = vmatprep.subr.bf16.mxu0 %v2313_v5  ;;  %v435_v59 = vpack.c.bf16 %v365_v53, %v358_v51  ;;  %v333_v51 = vld [vmem:[%s2492_s26 + $0x178] sm:$0xff]  ;;  %v320_v53 = vld [vmem:[%s2492_s26 + $0x110] sm:$0xff]  ;;  %v347_v63 = vld [vmem:[%s2492_s26 + $0x1e8] sm:$0xff] }
  0x34   : > { %2254 = vmatprep.subr.bf16.mxu1 %v2313_v5  ;;  %v387_v5 = vld [vmem:[%s2492_s26 + $0x328] sm:$0xff] }
  0x35   : > { %919 = vmatmul.mubr.bf16.gmra.mxu0 %v405_v56  ;;  %v373_v56 = vld [vmem:[%s2492_s26 + $0x2b8] sm:$0xff] }
  0x36   : > { %1016 = vmatmul.mubr.bf16.gmra.mxu1 %v407_v58  ;;  %926 = vmatprep.mubr.bf16.mxu0 %v413_v62  ;;  %v433_v58 = vpack.c.bf16 %v363_v50, %v356_v48  ;;  %v443_v61 = vpack.c.bf16 %v380_v57, %v373_v56  ;;  %v2325_v62 = vld [vmem:[%s2898_s1 + $0x180] sm:$0xff]   ;;  %v325_v48 = vld [vmem:[%s2492_s26 + $0x138] sm:$0xff] }
  0x37   : > { %1023 = vmatprep.mubr.bf16.mxu1 %v415_v1  ;;  %2082 = vmatpush3.bf16.msra.mxu0 %v2314_v6  ;;  %v372_v1 = vld [vmem:[%s2492_s26 + $0x2b0] sm:$0xff]  ;;  %v313_v50 = vld [vmem:[%s2492_s26 + $0xd8] sm:$0xff] }
  0x38   : > { %2262 = vmatpush3.bf16.msra.mxu1 %v2314_v6  ;;  %2083 = vmatprep.subr.bf16.mxu0 %v2315_v15  ;;  %v394_v6 = vld [vmem:[%s2492_s26 + $0x360] sm:$0xff]  ;;  %v442_v8 = vpack.c.bf16 %v379_v2, %v372_v1  ;;  %v348_v1 = vld [vmem:[%s2492_s26 + $0x1f0] sm:$0xff]  ;;  %v355_v2 = vld [vmem:[%s2492_s26 + $0x228] sm:$0xff] }
  0x39   : > { %2255 = vmatprep.subr.bf16.mxu1 %v2315_v15  ;;  %v450_v10 = vpack.c.bf16 %v394_v6, %v387_v5  ;;  %v291_v15 = vld [vmem:[%s2492_s26 + $0x28] sm:$0xff]  ;;  %v431_v5 = vpack.c.bf16 %v354_v0, %v347_v63  ;;  %v432_v6 = vpack.c.bf16 %v355_v2, %v348_v1 }
  0x3b   : > { %2084 = vmatpush3.bf16.msra.mxu0 %v2316_v17 }
  0x3c   : > { %2263 = vmatpush3.bf16.msra.mxu1 %v2316_v17  ;;  %2085 = vmatprep.subr.bf16.mxu0 %v2317_v24  ;;  %v375_v17 = vld [vmem:[%s2492_s26 + $0x2c8] sm:$0xff] }
  0x3d   : > { %927 = vmatmul.mubr.bf16.gmra.mxu0 %v412_v12  ;;  %2256 = vmatprep.subr.bf16.mxu1 %v2317_v24  ;;  %v391_v12 = vld [vmem:[%s2492_s26 + $0x348] sm:$0xff]  ;;  %v445_v22 = vpack.c.bf16 %v382_v18, %v375_v17  ;;  %v297_v24 = vld [vmem:[%s2492_s26 + $0x58] sm:$0xff] }
  0x3e   : > { %1024 = vmatmul.mubr.bf16.gmra.mxu1 %v414_v13  ;;  %934 = vmatprep.mubr.bf16.mxu0 %v420_v14  ;;  %v386_v13 = vld [vmem:[%s2492_s26 + $0x320] sm:$0xff]  ;;  %v393_v14 = vld [vmem:[%s2492_s26 + $0x358] sm:$0xff]  ;;  %v447_v19 = vpack.c.bf16 %v391_v12, %v384_v11  ;;  %v368_v12 = vld [vmem:[%s2492_s26 + $0x290] sm:$0xff] }
  0x3f   : > { %1031 = vmatprep.mubr.bf16.mxu1 %v422_v16  ;;  %2086 = vmatpush3.bf16.msra.mxu0 %v2318_v27  ;;  %v298_v16 = vld [vmem:[%s2492_s26 + $0x60] sm:$0xff]  ;;  %v449_v20 = vpack.c.bf16 %v393_v14, %v386_v13  ;;  %v361_v11 = vld [vmem:[%s2492_s26 + $0x258] sm:$0xff]  ;;  %v376_v13 = vld [vmem:[%s2492_s26 + $0x2d0] sm:$0xff] }
  0x40   : > { %2264 = vmatpush3.bf16.msra.mxu1 %v2318_v27  ;;  %2087 = vmatprep.subr.bf16.mxu0 %v2319_v32  ;;  %v403_v21 = vpack.c.bf16 %v298_v16, %v291_v15  ;;  %v305_v27 = vld [vmem:[%s2492_s26 + $0x98] sm:$0xff]  ;;  %v383_v14 = vld [vmem:[%s2492_s26 + $0x308] sm:$0xff]  ;;  %v438_v17 = vpack.c.bf16 %v368_v12, %v361_v11 }
  0x41   : > { %2257 = vmatprep.subr.bf16.mxu1 %v2319_v32  ;;  %v444_v32 = vpack.c.bf16 %v381_v26, %v374_v25  ;;  %v446_v18 = vpack.c.bf16 %v383_v14, %v376_v13  ;;  %v2326_v25 = vld [vmem:[%s2900_s3 + $0x38] sm:$0xff]   ;;  %v2327_v26 = vld [vmem:[%s2900_s3 + $0x30] sm:$0xff]  }
  0x43   : > { %2088 = vmatpush3.bf16.msra.mxu0 %v2320_v33 }
  0x44   : > { %2265 = vmatpush3.bf16.msra.mxu1 %v2320_v33  ;;  %2089 = vmatprep.subr.bf16.mxu0 %v2321_v42 }
  0x45   : > { %935 = vmatmul.mubr.bf16.gmra.mxu0 %v419_v28  ;;  %2258 = vmatprep.subr.bf16.mxu1 %v2321_v42  ;;  %v312_v28 = vld [vmem:[%s2492_s26 + $0xd0] sm:$0xff]  ;;  %v299_v42 = vld [vmem:[%s2492_s26 + $0x68] sm:$0xff] }
  0x46   : > { %1032 = vmatmul.mubr.bf16.gmra.mxu1 %v421_v29  ;;  %942 = vmatprep.mubr.bf16.mxu0 %v427_v30  ;;  %v389_v29 = vld [vmem:[%s2492_s26 + $0x338] sm:$0xff]  ;;  %v396_v30 = vld [vmem:[%s2492_s26 + $0x370] sm:$0xff]  ;;  %v410_v33 = vpack.c.bf16 %v312_v28, %v305_v27  ;;  %v2328_v27 = vld [vmem:[%s2900_s3 + $0x28] sm:$0xff]  }
  0x47   : > { %1039 = vmatprep.mubr.bf16.mxu1 %v429_v31  ;;  %2090 = vmatpush3.bf16.msra.mxu0 %v2322_v44  ;;  %v402_v31 = vpack.c.bf16 %v297_v24, %v290_v23  ;;  %v452_v34 = vpack.c.bf16 %v396_v30, %v389_v29  ;;  %v2329_v28 = vld [vmem:[%s2900_s3 + $0x20] sm:$0xff]   ;;  %v2330_v29 = vld [vmem:[%s2900_s3 + $0x18] sm:$0xff]   ;;  %v2331_v30 = vld [vmem:[%s2900_s3 + $0x10] sm:$0xff]  }
  0x48   : > { %2266 = vmatpush3.bf16.msra.mxu1 %v2322_v44  ;;  %2091 = vmatprep.subr.bf16.mxu0 %v2323_v49  ;;  %v451_v44 = vpack.c.bf16 %v395_v38, %v388_v37  ;;  %v2704_v37 = vld [vmem:[%s2899_s2] ss:$0 sm:$0xff] }
  0x49   : > { %2259 = vmatprep.subr.bf16.mxu1 %v2323_v49  ;;  %v306_v49 = vld [vmem:[%s2492_s26 + $0xa0] sm:$0xff] }
  0x4a   : > { %v411_v56 = vpack.c.bf16 %v313_v50, %v306_v49 }
  0x4b   : > { %2092 = vmatpush3.bf16.msra.mxu0 %v2324_v52 }
  0x4c   : > { %2267 = vmatpush3.bf16.msra.mxu1 %v2324_v52  ;;  %v340_v52 = vld [vmem:[%s2492_s26 + $0x1b0] sm:$0xff] }
  0x4d   : > { %943 = vmatmul.mubr.bf16.gmra.mxu0 %v426_v43  ;;  %2178 = vmatprep.subr.bf16.mxu1 %v2325_v62  ;;  %v409_v43 = vpack.c.bf16 %v311_v36, %v304_v35  ;;  %v424_v57 = vpack.c.bf16 %v340_v52, %v333_v51  ;;  %v2334_v35 = vld [vmem:[%s2902_s5 + $0x18] sm:$0xff]   ;;  %v2335_v36 = vld [vmem:[%s2902_s5 + $0x10] sm:$0xff]  }
  0x4e   : > { %1040 = vmatmul.mubr.bf16.gmra.mxu1 %v428_v45  ;;  %950 = vmatprep.mubr.bf16.mxu0 %v434_v46  ;;  %v417_v45 = vpack.c.bf16 %v326_v40, %v319_v39  ;;  %v404_v46 = vpack.c.bf16 %v299_v42, %v292_v41 }
  0x4f   : > { %1047 = vmatprep.mubr.bf16.mxu1 %v436_v47  ;;  %v318_v47 = vld [vmem:[%s2492_s26 + $0x100] sm:$0xff]  ;;  %2228 = vmatprep.subr.bf16.mxu0 %v2334_v35 }
  0x50   : > { %v416_v55 = vpack.c.bf16 %v325_v48, %v318_v47 }
  0x55   : > { %951 = vmatmul.mubr.bf16.gmra.mxu0 %v433_v58  ;;  %v418_v58 = vpack.c.bf16 %v327_v54, %v320_v53 }
  0x56   : > { %1048 = vmatmul.mubr.bf16.gmra.mxu1 %v435_v59  ;;  %958 = vmatprep.mubr.bf16.mxu0 %v441_v60  ;;  %v332_v59 = vld [vmem:[%s2492_s26 + $0x170] sm:$0xff]  ;;  %v339_v60 = vld [vmem:[%s2492_s26 + $0x1a8] sm:$0xff] }
  0x57   : > { %1055 = vmatprep.mubr.bf16.mxu1 %v443_v61  ;;  %v334_v61 = vld [vmem:[%s2492_s26 + $0x180] sm:$0xff]  ;;  %v423_v3 = vpack.c.bf16 %v339_v60, %v332_v59 }
  0x5d   : > { %959 = vmatmul.mubr.bf16.gmra.mxu0 %v440_v7  ;;  %v346_v7 = vld [vmem:[%s2492_s26 + $0x1e0] sm:$0xff] }
  0x5e   : > { %1056 = vmatmul.mubr.bf16.gmra.mxu1 %v442_v8  ;;  %966 = vmatprep.mubr.bf16.mxu0 %v448_v9  ;;  %v353_v8 = vld [vmem:[%s2492_s26 + $0x218] sm:$0xff]  ;;  %v362_v9 = vld [vmem:[%s2492_s26 + $0x260] sm:$0xff] }
  0x5f   : > { %1063 = vmatprep.mubr.bf16.mxu1 %v450_v10  ;;  %v369_v10 = vld [vmem:[%s2492_s26 + $0x298] sm:$0xff]  ;;  %v430_v15 = vpack.c.bf16 %v353_v8, %v346_v7 }
  0x60   : > { %v439_v16 = vpack.c.bf16 %v369_v10, %v362_v9 }
  0x65   : > { %967 = vmatmul.mubr.bf16.gmra.mxu0 %v447_v19  ;;  %v360_v19 = vld [vmem:[%s2492_s26 + $0x250] sm:$0xff] }
  0x66   : > { %1064 = vmatmul.mubr.bf16.gmra.mxu1 %v449_v20  ;;  %1104 = vmatprep.mubr.bf16.mxu0 %v403_v21  ;;  %v367_v20 = vld [vmem:[%s2492_s26 + $0x288] sm:$0xff]  ;;  %v390_v21 = vld [vmem:[%s2492_s26 + $0x340] sm:$0xff] }
  0x67   : > { %1152 = vmatprep.mubr.bf16.mxu1 %v445_v22  ;;  %v397_v22 = vld [vmem:[%s2492_s26 + $0x378] sm:$0xff]  ;;  %v437_v23 = vpack.c.bf16 %v367_v20, %v360_v19 }
  0x68   : > { %v453_v24 = vpack.c.bf16 %v397_v22, %v390_v21 }
  0x6d   : > { %1105 = vmatmul.mubr.bf16.vlgmr.msra.gmra.mxu0 %v402_v31  ;;  %v2332_v31 = vld [vmem:[%s2900_s3 + $0x8] sm:$0xff]  }
  0x6e   : > { %1153 = vmatmul.mubr.bf16.vlgmr.msra.gmra.mxu1 %v444_v32  ;;  %1112 = vmatprep.mubr.bf16.mxu0 %v410_v33  ;;  %v2333_v32 = vld [vmem:[%s2900_s3] sm:$0xff]  }
  0x6f   : > { %1160 = vmatprep.mubr.bf16.mxu1 %v452_v34  ;;  %2179 = vmatpush3.bf16.msra.mxu1 %v2325_v62  ;;  %v341_v62 = vld [vmem:[%s2492_s26 + $0x1b8] sm:$0xff] }
  0x70   : > { %v425_v4 = vpack.c.bf16 %v341_v62, %v334_v61  ;;  %2196 = vmatprep.subr.bf16.mxu1 %v2326_v25  ;;  %2229 = vmatpush3.bf16.msra.mxu0 %v2334_v35 }
  0x71   : > { %2230 = vmatprep.subr.bf16.mxu0 %v2335_v36 }
  0x74   : > { %2231 = vmatpush3.bf16.msra.mxu0 %v2335_v36 }
  0x75   : > { %1113 = vmatmul.mubr.bf16.gmra.mxu0 %v409_v43 }
  0x76   : > { %1161 = vmatmul.mubr.bf16.gmra.mxu1 %v451_v44  ;;  %1120 = vmatprep.mubr.bf16.mxu0 %v417_v45 }
  0x77   : > { %2180 = vmatprep.mubr.msk.bf16.mxu1 %vm853_vm0, %v404_v46 }
  0x7d   : > { %1121 = vmatmul.mubr.bf16.gmra.mxu0 %v416_v55 }
  0x7e   : > { %2181 = vmatmul.mubr.msk.bf16.vlgmr.msra.gmra.mxu1 %vm853_vm0, %v411_v56  ;;  %1128 = vmatprep.mubr.bf16.mxu0 %v424_v57 }
  0x7f   : > { %2184 = vmatprep.mubr.msk.bf16.mxu1 %vm853_vm0, %v418_v58  ;;  %2197 = vmatpush3.bf16.msra.mxu1 %v2326_v25 }
  0x80   : > { %2198 = vmatprep.subr.bf16.mxu1 %v2327_v26 }
  0x83   : > { %2199 = vmatpush3.bf16.msra.mxu1 %v2327_v26 }
  0x84   : > { %2200 = vmatprep.subr.bf16.mxu1 %v2328_v27 }
  0x85   : > { %1129 = vmatmul.mubr.bf16.gmra.mxu0 %v423_v3 }
  0x86   : > { %2185 = vmatmul.mubr.msk.bf16.gmra.mxu1 %vm853_vm0, %v425_v4  ;;  %1136 = vmatprep.mubr.bf16.mxu0 %v431_v5 }
  0x87   : > { %2188 = vmatprep.mubr.msk.bf16.mxu1 %vm853_vm0, %v432_v6  ;;  %2201 = vmatpush3.bf16.msra.mxu1 %v2328_v27 }
  0x88   : > { %2202 = vmatprep.subr.bf16.mxu1 %v2329_v28 }
  0x8b   : > { %2203 = vmatpush3.bf16.msra.mxu1 %v2329_v28 }
  0x8c   : > { %2204 = vmatprep.subr.bf16.mxu1 %v2330_v29 }
  0x8d   : > { %1137 = vmatmul.mubr.bf16.gmra.mxu0 %v430_v15 }
  0x8e   : > { %2189 = vmatmul.mubr.msk.bf16.gmra.mxu1 %vm853_vm0, %v439_v16  ;;  %1144 = vmatprep.mubr.bf16.mxu0 %v438_v17 }
  0x8f   : > { %2192 = vmatprep.mubr.msk.bf16.mxu1 %vm853_vm0, %v446_v18  ;;  %2205 = vmatpush3.bf16.msra.mxu1 %v2330_v29 }
  0x90   : > { %2206 = vmatprep.subr.bf16.mxu1 %v2331_v30 }
  0x93   : > { %2207 = vmatpush3.bf16.msra.mxu1 %v2331_v30 }
  0x94   : > { %2208 = vmatprep.subr.bf16.mxu1 %v2332_v31 }
  0x95   : > { %1145 = vmatmul.mubr.bf16.gmra.mxu0 %v437_v23 }
  0x96   : > { %2193 = vmatmul.mubr.msk.bf16.gmra.mxu1 %vm853_vm0, %v453_v24 }
  0x97   : > { %2209 = vmatpush3.bf16.msra.mxu1 %v2332_v31 }
  0x98   : > { %2210 = vmatprep.subr.bf16.mxu1 %v2333_v32 }
  0x9b   : > { %2211 = vmatpush3.bf16.msra.mxu1 %v2333_v32 }
  0xed   : > { %v1965_v33 = vpop.f32.mrf.mxu0 }
  0xee   : > { %v2029_v34 = vpop.f32.mrf.mxu1 }
  0xef   : > { %v1966_v38 = vpop.f32.mrf.mxu0 }
  0xf0   : > { %v1967_v39 = vadd.f32 %v1966_v38, %v1965_v33  ;;  %v2030_v40 = vpop.f32.mrf.mxu1 }
  0xf1   : > { %v2031_v41 = vadd.f32 %v2030_v40, %v2029_v34  ;;  %v1968_v42 = vpop.f32.mrf.mxu0 }
  0xf2   : > { %v913_v43 = vadd.f32 %v1967_v39, %v2704_v37  ;;  %v2032_v44 = vpop.f32.mrf.mxu1 }
  0xf3   : > { %v1969_v45 = vpop.f32.mrf.mxu0 }
  0xf4   : > { %v2707_v46 = vadd.f32 %v2031_v41, %v913_v43  ;;  %v1970_v47 = vadd.f32 %v1969_v45, %v1968_v42  ;;  %v2033_v48 = vpop.f32.mrf.mxu1 }
  0xf5   : > { %v2034_v49 = vadd.f32 %v2033_v48, %v2032_v44  ;;  %v1971_v50 = vpop.f32.mrf.mxu0 }
  0xf6   : > { %v916_v51 = vadd.f32 %v1970_v47, %v2704_v37  ;;  %v2035_v52 = vpop.f32.mrf.mxu1 }
  0xf7   : > { %v1972_v53 = vpop.f32.mrf.mxu0 }
  0xf8   : > { %v2710_v54 = vadd.f32 %v2034_v49, %v916_v51  ;;  %v1973_v55 = vadd.f32 %v1972_v53, %v1971_v50  ;;  %v2036_v56 = vpop.f32.mrf.mxu1 }
  0xf9   : > { %v2037_v57 = vadd.f32 %v2036_v56, %v2035_v52  ;;  %v1974_v58 = vpop.f32.mrf.mxu0 }
  0xfa   : > { %v921_v59 = vadd.f32 %v1973_v55, %v2704_v37  ;;  %v2038_v60 = vpop.f32.mrf.mxu1 }
  0xfb   : > { %v1975_v61 = vpop.f32.mrf.mxu0 }
  0xfc   : > { %v2713_v62 = vadd.f32 %v2037_v57, %v921_v59  ;;  %v1976_v63 = vadd.f32 %v1975_v61, %v1974_v58  ;;  %v2039_v0 = vpop.f32.mrf.mxu1 }
  0xfd   : > { %v2040_v1 = vadd.f32 %v2039_v0, %v2038_v60  ;;  %v1977_v2 = vpop.f32.mrf.mxu0 }
  0xfe   : > { %v924_v3 = vadd.f32 %v1976_v63, %v2704_v37  ;;  %v2041_v4 = vpop.f32.mrf.mxu1 }
  0xff   : > { %v1978_v5 = vpop.f32.mrf.mxu0 }
 0x100   : > { %v2716_v6 = vadd.f32 %v2040_v1, %v924_v3  ;;  %v1979_v7 = vadd.f32 %v1978_v5, %v1977_v2  ;;  %v2042_v8 = vpop.f32.mrf.mxu1 }
 0x101   : > { %v2043_v9 = vadd.f32 %v2042_v8, %v2041_v4  ;;  %v1980_v10 = vpop.f32.mrf.mxu0 }
 0x102   : > { %v929_v11 = vadd.f32 %v1979_v7, %v2704_v37  ;;  %v2044_v12 = vpop.f32.mrf.mxu1 }
 0x103   : > { %v1981_v13 = vpop.f32.mrf.mxu0 }
 0x104   : > { %v2719_v14 = vadd.f32 %v2043_v9, %v929_v11  ;;  %v1982_v15 = vadd.f32 %v1981_v13, %v1980_v10  ;;  %v2045_v16 = vpop.f32.mrf.mxu1 }
 0x105   : > { %v2046_v17 = vadd.f32 %v2045_v16, %v2044_v12  ;;  %v1983_v18 = vpop.f32.mrf.mxu0 }
 0x106   : > { %v932_v19 = vadd.f32 %v1982_v15, %v2704_v37  ;;  %v2047_v20 = vpop.f32.mrf.mxu1 }
 0x107   : > { %v1984_v21 = vpop.f32.mrf.mxu0 }
 0x108   : > { %v2722_v22 = vadd.f32 %v2046_v17, %v932_v19  ;;  %v1985_v23 = vadd.f32 %v1984_v21, %v1983_v18  ;;  %v2048_v24 = vpop.f32.mrf.mxu1 }
 0x109   : > { %v2049_v25 = vadd.f32 %v2048_v24, %v2047_v20  ;;  %v2724_v26 = vpop.f32.mrf.mxu0 }
 0x10a   : > { %v937_v27 = vadd.f32 %v1985_v23, %v2704_v37  ;;  %v2727_v28 = vpop.f32.mrf.mxu1 }
 0x10b   : > { %v2729_v29 = vpop.f32.mrf.mxu0 }
 0x10c   : > { %v2731_v30 = vadd.f32 %v2049_v25, %v937_v27  ;;  %v2733_v31 = vpop.f32.mrf.mxu1 }
 0x10d   : > { %v1989_v32 = vpop.f32.mrf.mxu0 }
 0x10e   : > { %v2053_v33 = vpop.f32.mrf.mxu1 }
 0x10f   : > { %v1990_v34 = vpop.f32.mrf.mxu0 }
 0x110   : > { %v1991_v35 = vadd.f32 %v1990_v34, %v1989_v32  ;;  %v2054_v36 = vpop.f32.mrf.mxu1 }
 0x111   : > { %v2055_v38 = vadd.f32 %v2054_v36, %v2053_v33  ;;  %v2735_v39 = vpop.f32.mrf.mxu0 }
 0x112   : > { %v945_v40 = vadd.f32 %v1991_v35, %v2704_v37  ;;  %v2738_v41 = vpop.f32.mrf.mxu1 }
 0x113   : > { %v2740_v42 = vpop.f32.mrf.mxu0 }
 0x114   : > { %v2742_v43 = vadd.f32 %v2055_v38, %v945_v40  ;;  %v2744_v44 = vpop.f32.mrf.mxu1 }
 0x115   : > { %v1995_v45 = vpop.f32.mrf.mxu0 }
 0x116   : > { %v2059_v47 = vpop.f32.mrf.mxu1 }
 0x117   : > { %v1996_v48 = vpop.f32.mrf.mxu0 }
 0x118   : > { %v1997_v49 = vadd.f32 %v1996_v48, %v1995_v45  ;;  %v2060_v50 = vpop.f32.mrf.mxu1 }
 0x119   : > { %v2061_v51 = vadd.f32 %v2060_v50, %v2059_v47  ;;  %v2746_v52 = vpop.f32.mrf.mxu0 }
 0x11a   : > { %v953_v53 = vadd.f32 %v1997_v49, %v2704_v37  ;;  %v2749_v55 = vpop.f32.mrf.mxu1 }
 0x11b   : > { %v2751_v56 = vpop.f32.mrf.mxu0 }
 0x11c   : > { %v2753_v57 = vadd.f32 %v2061_v51, %v953_v53  ;;  %v2755_v58 = vpop.f32.mrf.mxu1 }
 0x11d   : > { %v2757_v59 = vpop.f32.mrf.mxu0 }
 0x11e   : > { %v2759_v60 = vpop.f32.mrf.mxu1 }
 0x11f   : > { %v2761_v61 = vpop.f32.mrf.mxu0 }
 0x120   : > { %v2763_v63 = vpop.f32.mrf.mxu1 }
 0x121   : > { %v2765_v0 = vpop.f32.mrf.mxu0 }
 0x122   : > { %v2767_v1 = vpop.f32.mrf.mxu1 }
 0x123   : > { %v2769_v2 = vpop.f32.mrf.mxu0 }
 0x124   : > { %v2771_v3 = vpop.f32.mrf.mxu1 }
 0x125   : > { %v2773_v4 = vpop.f32.mrf.mxu0 }
 0x126   : > { %v2775_v5 = vpop.f32.mrf.mxu1 }
 0x127   : > { %2905 = vst [vmem:[#allocation2_spill] sm:$0xff] %v2775_v5  ;;  %v2777_v7 = vpop.f32.mrf.mxu0 }
 0x128   : > { %v2779_v8 = vpop.f32.mrf.mxu1 }
 0x129   : > { %2906 = vst [vmem:[#allocation3_spill] sm:$0xff] %v2779_v8  ;;  %v2781_v9 = vpop.f32.mrf.mxu0 }
 0x12a   : > { %v2783_v10 = vpop.f32.mrf.mxu1 }
 0x12b   : > { %v2785_v11 = vpop.f32.mrf.mxu0 }
 0x12c   : > { %v2787_v12 = vpop.f32.mrf.mxu1 }
 0x12d   : > { %v2093_v13 = vpop.f32.mrf.mxu0 }
 0x12e   : > { %v2789_v15 = vpop.f32.mrf.mxu1 }
 0x12f   : > { %v2094_v16 = vpop.f32.mrf.mxu0 }
 0x130   : > { %v2791_v17 = vpop.f32.mrf.mxu1  ;;  %v2095_v38 = vadd.f32 %v2094_v16, %v2093_v13  ;;  %v1988_v16 = vadd.f32 %v2729_v29, %v2724_v26 }
 0x131   : > { %v2096_v18 = vpop.f32.mrf.mxu0 }
 0x132   : > { %v2793_v19 = vpop.f32.mrf.mxu1 }
 0x133   : > { %v2097_v20 = vpop.f32.mrf.mxu0 }
 0x134   : > { %v2795_v21 = vpop.f32.mrf.mxu1  ;;  %v2098_v48 = vadd.f32 %v2097_v20, %v2096_v18 }
 0x135   : > { %v2099_v23 = vpop.f32.mrf.mxu0 }
 0x136   : > { %v2797_v24 = vpop.f32.mrf.mxu1  ;;  %v1110_v13 = vadd.f32 %v2098_v48, %v2710_v54  ;;  %v2052_v54 = vadd.f32 %v2733_v31, %v2727_v28 }
 0x137   : > { %2907 = vst [vmem:[#allocation4_spill] sm:$0xff] %v2797_v24  ;;  %v2100_v25 = vpop.f32.mrf.mxu0  ;;  %v1107_v24 = vadd.f32 %v2095_v38, %v2707_v46 }
 0x138   : > { %v2799_v27 = vpop.f32.mrf.mxu1  ;;  %v2101_v34 = vadd.f32 %v2100_v25, %v2099_v23 }
 0x139   : > { %2908 = vst [vmem:[#allocation5_spill] sm:$0xff] %v2799_v27  ;;  %v2102_v32 = vpop.f32.mrf.mxu0 }
 0x13a   : > { %v2801_v33 = vpop.f32.mrf.mxu1  ;;  %v1115_v49 = vadd.f32 %v2101_v34, %v2713_v62 }
 0x13b   : > { %2909 = vst [vmem:[#allocation6_spill] sm:$0xff] %v2801_v33  ;;  %v2103_v35 = vpop.f32.mrf.mxu0 }
 0x13c   : > { %v2803_v36 = vpop.f32.mrf.mxu1  ;;  %v2104_v40 = vadd.f32 %v2103_v35, %v2102_v32 }
 0x13d   : > { %v2105_v45 = vpop.f32.mrf.mxu0 }
 0x13e   : > { %v2182_v47 = vpop.f32.mrf.mxu1  ;;  %v1118_v8 = vadd.f32 %v2104_v40, %v2716_v6 }
 0x13f   : > { %v2106_v50 = vpop.f32.mrf.mxu0  ;;  %v1212_v53 = vadd.f32 %v2182_v47, %v1115_v49 }
 0x140   : > { %v1203_v51 = vpop.f32.mrf.mxu1  ;;  %v2107_v62 = vadd.f32 %v2106_v50, %v2105_v45 }
 0x141   : > { %v2108_v27 = vpop.f32.mrf.mxu0  ;;  %v1204_v23 = vadd.f32 %v1203_v51, %v1107_v24  ;;  %v1268_v20 = vmax.f32 %v1212_v53, 0.0 }
 0x142   : > { %v2183_v33 = vpop.f32.mrf.mxu1  ;;  %v1123_v29 = vadd.f32 %v2107_v62, %v2719_v14 }
 0x143   : > { %v1215_v25 = vadd.f32 %v2183_v33, %v1118_v8  ;;  %v2109_v5 = vpop.f32.mrf.mxu0  ;;  %v1266_v46 = vmax.f32 %v1204_v23, 0.0  ;;  %v940_v8 = vadd.f32 %v1988_v16, %v2704_v37  ;;  %v1994_v23 = vadd.f32 %v2740_v42, %v2735_v39 }
 0x144   : > { %v1206_v18 = vpop.f32.mrf.mxu1  ;;  %v2110_v49 = vadd.f32 %v2109_v5, %v2108_v27  ;;  %v2006_v42 = vadd.f32 %v2769_v2, %v2765_v0  ;;  %v2070_v2 = vadd.f32 %v2771_v3, %v2767_v1  ;;  %v2012_v1 = vadd.f32 %v2785_v11, %v2781_v9 }
 0x145   : > { %v1269_v32 = vmax.f32 %v1215_v25, 0.0  ;;  %v1207_v34 = vadd.f32 %v1206_v18, %v1110_v13  ;;  %v2111_v35 = vpop.f32.mrf.mxu0  ;;  %v1037_v27 = vadd.f32 %v2052_v54, %v940_v8  ;;  %v2000_v8 = vadd.f32 %v2751_v56, %v2746_v52 }
 0x146   : > { %v2186_v47 = vpop.f32.mrf.mxu1  ;;  %v1126_v5 = vadd.f32 %v2110_v49, %v2722_v22  ;;  %v2058_v22 = vadd.f32 %v2744_v44, %v2738_v41  ;;  %v2003_v54 = vadd.f32 %v2761_v61, %v2757_v59  ;;  %v964_v0 = vadd.f32 %v2006_v42, %v2704_v37 }
 0x147   : > { %v1283_v38 = vpack.c.bf16 %v1269_v32, %v1268_v20  ;;  %v1267_v6 = vmax.f32 %v1207_v34, 0.0  ;;  %v2112_v40 = vpop.f32.mrf.mxu0  ;;  %v948_v32 = vadd.f32 %v1994_v23, %v2704_v37  ;;  %v956_v59 = vadd.f32 %v2000_v8, %v2704_v37 }
 0x148   : > { %v2113_v24 = vadd.f32 %v2112_v40, %v2111_v35  ;;  %v1219_v33 = vpop.f32.mrf.mxu1  ;;  %v961_v61 = vadd.f32 %v2003_v54, %v2704_v37  ;;  %v2009_v23 = vadd.f32 %v2777_v7, %v2773_v4  ;;  %v972_v11 = vadd.f32 %v2012_v1, %v2704_v37 }
 0x149   : > { %v1282_v26 = vpack.c.bf16 %v1267_v6, %v1266_v46  ;;  %v2114_v45 = vpop.f32.mrf.mxu0  ;;  %v1220_v51 = vadd.f32 %v1219_v33, %v1123_v29  ;;  %v1045_v44 = vadd.f32 %v2058_v22, %v948_v32 }
 0x14a   : > { %v1131_v48 = vadd.f32 %v2113_v24, %v2731_v30  ;;  %v2187_v50 = vpop.f32.mrf.mxu1 }
 0x14b   : > { %2212 = vmatprep.mubr.bf16.mxu1 %v1282_v26  ;;  %v2115_v53 = vpop.f32.mrf.mxu0  ;;  %v1270_v30 = vmax.f32 %v1220_v51, 0.0 }
 0x14c   : > { %v2116_v25 = vadd.f32 %v2115_v53, %v2114_v45  ;;  %v1222_v28 = vpop.f32.mrf.mxu1  ;;  %2213 = vmatmul.mubr.bf16.vlgmr.msra.gmra.mxu1 %v1283_v38  ;;  %v1228_v16 = vadd.f32 %v2186_v47, %v1131_v48  ;;  %v2067_v48 = vadd.f32 %v2763_v63, %v2759_v60  ;;  %v1061_v53 = vadd.f32 %v2070_v2, %v964_v0  ;;  %v2337_v0 = vld [vmem:[%s2902_s5] sm:$0xff]  }
 0x14d   : > { %v1223_v31 = vadd.f32 %v1222_v28, %v1126_v5  ;;  %v2117_v13 = vpop.f32.mrf.mxu0  ;;  %v2131_v5 = vadd.f32 %v2791_v17, %v2789_v15 }
 0x14e   : > { %v1134_v14 = vadd.f32 %v2116_v25, %v1037_v27  ;;  %v2819_v18 = vpop.f32.mrf.mxu1  ;;  %v1272_v47 = vmax.f32 %v1228_v16, 0.0  ;;  %v1058_v28 = vadd.f32 %v2067_v48, %v961_v61 }
 0x14f   : > { %v1271_v20 = vmax.f32 %v1223_v31, 0.0  ;;  %v2118_v62 = vpop.f32.mrf.mxu0 }
 0x150   : > { %v1231_v34 = vadd.f32 %v2187_v50, %v1134_v14  ;;  %v2119_v35 = vadd.f32 %v2118_v62, %v2117_v13  ;;  %v1235_v39 = vpop.f32.mrf.mxu1  ;;  %v2134_v50 = vadd.f32 %v2795_v21, %v2793_v19  ;;  %v2076_v13 = vadd.f32 %v2787_v12, %v2783_v10  ;;  %v2910_v14 = vld [vmem:[#allocation2_spill] sm:$0xff]  ;;  %v2913_v10 = vld [vmem:[#allocation4_spill] sm:$0xff]  ;;  %v2914_v12 = vld [vmem:[#allocation5_spill] sm:$0xff] }
 0x151   : > { %v1284_v46 = vpack.c.bf16 %v1271_v20, %v1270_v30  ;;  %v2120_v38 = vpop.f32.mrf.mxu0  ;;  %v2911_v30 = vld [vmem:[#allocation3_spill] sm:$0xff]  ;;  %v1155_v7 = vadd.f32 %v2131_v5, %v1058_v28  ;;  %v2912_v62 = vld [vmem:[#allocation6_spill] sm:$0xff]  ;;  %v2137_v42 = vadd.f32 %v2914_v12, %v2913_v10 }
 0x152   : > { %v1273_v49 = vmax.f32 %v1231_v34, 0.0  ;;  %v1139_v6 = vadd.f32 %v2119_v35, %v2742_v43  ;;  %v2191_v40 = vpop.f32.mrf.mxu1  ;;  %v2064_v43 = vadd.f32 %v2755_v58, %v2749_v55  ;;  %v1158_v9 = vadd.f32 %v2134_v50, %v1061_v53 }
 0x153   : > { %2216 = vmatprep.mubr.bf16.mxu1 %v1284_v46  ;;  %v2121_v41 = vpop.f32.mrf.mxu0  ;;  %v2073_v4 = vadd.f32 %v2911_v30, %v2910_v14  ;;  %v2140_v32 = vadd.f32 %v2803_v36, %v2912_v62 }
 0x154   : > { %v2122_v24 = vadd.f32 %v2121_v41, %v2120_v38  ;;  %v1238_v33 = vpop.f32.mrf.mxu1  ;;  %v1285_v26 = vpack.c.bf16 %v1273_v49, %v1272_v47  ;;  %v1236_v45 = vadd.f32 %v1235_v39, %v1139_v6  ;;  %v1053_v21 = vadd.f32 %v2064_v43, %v956_v59  ;;  %v1846_v43 = vld [vmem:[%s2901_s4] ss:$0 sm:$0xff] }
 0x155   : > { %v2123_v29 = vpop.f32.mrf.mxu0  ;;  %v1069_v39 = vadd.f32 %v2076_v13, %v972_v11 }
 0x156   : > { %v1142_v52 = vadd.f32 %v2122_v24, %v1045_v44  ;;  %v2194_v56 = vpop.f32.mrf.mxu1  ;;  %2217 = vmatmul.mubr.bf16.gmra.mxu1 %v1285_v26  ;;  %v1274_v25 = vmax.f32 %v1236_v45, 0.0 }
 0x157   : > { %v2124_v51 = vpop.f32.mrf.mxu0  ;;  %v1166_v6 = vadd.f32 %v2140_v32, %v1069_v39 }
 0x158   : > { %v1239_v3 = vadd.f32 %v1238_v33, %v1142_v52  ;;  %v2125_v55 = vadd.f32 %v2124_v51, %v2123_v29  ;;  %v1251_v58 = vpop.f32.mrf.mxu1 }
 0x159   : > { %v2126_v27 = vpop.f32.mrf.mxu0  ;;  %v1252_v35 = vadd.f32 %v1251_v58, %v1155_v7 }
 0x15a   : > { %v1275_v60 = vmax.f32 %v1239_v3, 0.0  ;;  %v1147_v63 = vadd.f32 %v2125_v55, %v2753_v57  ;;  %v2195_v19 = vpop.f32.mrf.mxu1  ;;  %v969_v57 = vadd.f32 %v2009_v23, %v2704_v37 }
 0x15b   : > { %v2127_v31 = vpop.f32.mrf.mxu0  ;;  %v1278_v54 = vmax.f32 %v1252_v35, 0.0  ;;  %v1263_v41 = vadd.f32 %v2195_v19, %v1166_v6 }
 0x15c   : > { %v1286_v16 = vpack.c.bf16 %v1275_v60, %v1274_v25  ;;  %v2128_v15 = vadd.f32 %v2127_v31, %v2126_v27  ;;  %v1254_v17 = vpop.f32.mrf.mxu1  ;;  %v1244_v22 = vadd.f32 %v2819_v18, %v1147_v63  ;;  %v1066_v47 = vadd.f32 %v2073_v4, %v969_v57 }
 0x15d   : > { %v1255_v20 = vadd.f32 %v1254_v17, %v1158_v9  ;;  %v1281_v18 = vmax.f32 %v1263_v41, 0.0 }
 0x15e   : > { %v1150_v34 = vadd.f32 %v2128_v15, %v1053_v21  ;;  %2220 = vmatprep.mubr.bf16.mxu1 %v1286_v16  ;;  %v1276_v49 = vmax.f32 %v1244_v22, 0.0  ;;  %v1163_v37 = vadd.f32 %v2137_v42, %v1066_v47 }
 0x15f   : > { %v1279_v38 = vmax.f32 %v1255_v20, 0.0 }
 0x160   : > { %v1247_v46 = vadd.f32 %v2191_v40, %v1150_v34  ;;  %v1260_v24 = vadd.f32 %v2194_v56, %v1163_v37  ;;  %v2336_v40 = vld [vmem:[%s2902_s5 + $0x8] sm:$0xff]  }
 0x161   : > { %v1288_v36 = vpack.c.bf16 %v1279_v38, %v1278_v54  ;;  %2232 = vmatprep.subr.bf16.mxu0 %v2336_v40 }
 0x162   : > { %v1277_v8 = vmax.f32 %v1247_v46, 0.0  ;;  %v1280_v33 = vmax.f32 %v1260_v24, 0.0  ;;  %2233 = vmatpush3.bf16.msra.mxu0 %v2336_v40  ;;  %v1855_v24 = vld [vmem:[%s2903_s6] ss:$0 sm:$0xff] }
 0x163   : > { %2234 = vmatprep.subr.bf16.mxu0 %v2337_v0 }
 0x164   : > { %v1287_v44 = vpack.c.bf16 %v1277_v8, %v1276_v49  ;;  %v1289_v26 = vpack.c.bf16 %v1281_v18, %v1280_v33 }
 0x166   : > { %2221 = vmatmul.mubr.bf16.gmra.mxu1 %v1287_v44  ;;  %2235 = vmatpush3.bf16.msra.mxu0 %v2337_v0 }
 0x167   : > { %2224 = vmatprep.mubr.bf16.mxu1 %v1288_v36 }
 0x16e   : > { %2225 = vmatmul.mubr.bf16.gmra.mxu1 %v1289_v26 }
 0x20c   : > { %v2214_v2 = vpop.f32.mrf.mxu1 }
 0x20d   : > { %v1404_v59 = vadd.f32 %v2214_v2, %v1846_v43 }
 0x20e   : > { %v1395_v29 = vpop.f32.mrf.mxu1 }
 0x20f   : > { %v1396_v52 = vadd.f32 %v1846_v43, %v1395_v29  ;;  %v1460_v3 = vmax.f32 %v1404_v59, 0.0 }
 0x210   : > { %v2215_v45 = vpop.f32.mrf.mxu1 }
 0x211   : > { %v1407_v56 = vadd.f32 %v2215_v45, %v1846_v43  ;;  %v1458_v51 = vmax.f32 %v1396_v52, 0.0 }
 0x212   : > { %v1398_v61 = vpop.f32.mrf.mxu1 }
 0x213   : > { %v1399_v48 = vadd.f32 %v1846_v43, %v1398_v61  ;;  %v1461_v50 = vmax.f32 %v1407_v56, 0.0 }
 0x215   : > { %v1459_v1 = vmax.f32 %v1399_v48, 0.0  ;;  %v1475_v53 = vpack.c.bf16 %v1461_v50, %v1460_v3 }
 0x216   : > { %v2218_v55 = vpop.f32.mrf.mxu1 }
 0x217   : > { %v1474_v58 = vpack.c.bf16 %v1459_v1, %v1458_v51  ;;  %v1420_v60 = vadd.f32 %v2218_v55, %v1846_v43 }
 0x218   : > { %v1411_v5 = vpop.f32.mrf.mxu1 }
 0x219   : > { %2236 = vmatprep.mubr.msk.bf16.mxu0 %vm1521_vm1, %v1474_v58  ;;  %v1412_v23 = vadd.f32 %v1846_v43, %v1411_v5  ;;  %v1464_v9 = vmax.f32 %v1420_v60, 0.0 }
 0x21a   : > { %2237 = vmatmul.mubr.msk.bf16.vlgmr.msra.gmra.mxu0 %vm1521_vm1, %v1475_v53  ;;  %v2219_v27 = vpop.f32.mrf.mxu1 }
 0x21b   : > { %v1423_v25 = vadd.f32 %v2219_v27, %v1846_v43  ;;  %v1462_v28 = vmax.f32 %v1412_v23, 0.0 }
 0x21c   : > { %v1414_v63 = vpop.f32.mrf.mxu1 }
 0x21d   : > { %v1415_v19 = vadd.f32 %v1846_v43, %v1414_v63  ;;  %v1465_v21 = vmax.f32 %v1423_v25, 0.0 }
 0x21f   : > { %v1463_v31 = vmax.f32 %v1415_v19, 0.0  ;;  %v1477_v13 = vpack.c.bf16 %v1465_v21, %v1464_v9 }
 0x221   : > { %v1476_v11 = vpack.c.bf16 %v1463_v31, %v1462_v28 }
 0x223   : > { %2240 = vmatprep.mubr.msk.bf16.mxu0 %vm1521_vm1, %v1476_v11 }
 0x224   : > { %2241 = vmatmul.mubr.msk.bf16.gmra.mxu0 %vm1521_vm1, %v1477_v13 }
 0x226   : > { %v2222_v16 = vpop.f32.mrf.mxu1 }
 0x227   : > { %v1436_v4 = vadd.f32 %v2222_v16, %v1846_v43 }
 0x228   : > { %v1427_v15 = vpop.f32.mrf.mxu1 }
 0x229   : > { %v1428_v14 = vadd.f32 %v1846_v43, %v1427_v15  ;;  %v1468_v34 = vmax.f32 %v1436_v4, 0.0 }
 0x22a   : > { %v2223_v17 = vpop.f32.mrf.mxu1 }
 0x22b   : > { %v1439_v30 = vadd.f32 %v2223_v17, %v1846_v43  ;;  %v1466_v32 = vmax.f32 %v1428_v14, 0.0 }
 0x22c   : > { %v1430_v7 = vpop.f32.mrf.mxu1 }
 0x22d   : > { %v1431_v20 = vadd.f32 %v1846_v43, %v1430_v7  ;;  %v1469_v57 = vmax.f32 %v1439_v30, 0.0 }
 0x22e   : > { %v2226_v62 = vpop.f32.mrf.mxu1 }
 0x22f   : > { %v1467_v22 = vmax.f32 %v1431_v20, 0.0  ;;  %v1479_v10 = vpack.c.bf16 %v1469_v57, %v1468_v34  ;;  %v1452_v38 = vadd.f32 %v2226_v62, %v1846_v43 }
 0x230   : > { %v1443_v35 = vpop.f32.mrf.mxu1 }
 0x231   : > { %v1478_v39 = vpack.c.bf16 %v1467_v22, %v1466_v32  ;;  %v1444_v42 = vadd.f32 %v1846_v43, %v1443_v35  ;;  %v1472_v37 = vmax.f32 %v1452_v38, 0.0 }
 0x232   : > { %v2227_v12 = vpop.f32.mrf.mxu1 }
 0x233   : > { %v1455_v46 = vadd.f32 %v2227_v12, %v1846_v43  ;;  %2244 = vmatprep.mubr.msk.bf16.mxu0 %vm1521_vm1, %v1478_v39  ;;  %v1470_v8 = vmax.f32 %v1444_v42, 0.0 }
 0x234   : > { %v1446_v47 = vpop.f32.mrf.mxu1  ;;  %2245 = vmatmul.mubr.msk.bf16.gmra.mxu0 %vm1521_vm1, %v1479_v10 }
 0x235   : > { %v1447_v49 = vadd.f32 %v1846_v43, %v1446_v47  ;;  %v1473_v6 = vmax.f32 %v1455_v46, 0.0 }
 0x237   : > { %v1471_v54 = vmax.f32 %v1447_v49, 0.0  ;;  %v1481_v44 = vpack.c.bf16 %v1473_v6, %v1472_v37 }
 0x239   : > { %v1480_v41 = vpack.c.bf16 %v1471_v54, %v1470_v8 }
 0x23b   : > { %2248 = vmatprep.mubr.msk.bf16.mxu0 %vm1521_vm1, %v1480_v41 }
 0x23c   : > { %2249 = vmatmul.mubr.msk.bf16.gmra.mxu0 %vm1521_vm1, %v1481_v44 }
 0x2da   : > { %v2238_v36 = vpop.f32.mrf.mxu0 }
 0x2db   : > { %v1589_v26 = vadd.f32 %v2238_v36, %v1855_v24 }
 0x2dc   : > { %v1580_v18 = vpop.f32.mrf.mxu0 }
 0x2dd   : > { %v1581_v2 = vadd.f32 %v1855_v24, %v1580_v18 }
 0x2de   : > { %v2239_v33 = vpop.f32.mrf.mxu0 }
 0x2df   : > { %v1592_v40 = vadd.f32 %v2239_v33, %v1855_v24 }
 0x2e0   : > { %v1583_v0 = vpop.f32.mrf.mxu0 }
 0x2e1   : > { %v1910_v29 = vpack.c.bf16 %v1592_v40, %v1589_v26  ;;  %v1584_v43 = vadd.f32 %v1855_v24, %v1583_v0 }
 0x2e3   : > { %1942 = vst [vmem:[%s2884_s14 + $0x8] sm:$0xff] %v1910_v29   ;;  %v1905_v45 = vpack.c.bf16 %v1584_v43, %v1581_v2 }
 0x2e4   : > { %v2242_v52 = vpop.f32.mrf.mxu0 }
 0x2e5   : > { %1906 = vst [vmem:[%s2884_s14] sm:$0xff] %v1905_v45   ;;  %v1605_v61 = vadd.f32 %v2242_v52, %v1855_v24 }
 0x2e6   : > { %v1596_v56 = vpop.f32.mrf.mxu0 }
 0x2e7   : > { %v1597_v51 = vadd.f32 %v1855_v24, %v1596_v56 }
 0x2e8   : > { %v2243_v59 = vpop.f32.mrf.mxu0 }
 0x2e9   : > { %v1608_v48 = vadd.f32 %v2243_v59, %v1855_v24 }
 0x2ea   : > { %v1599_v50 = vpop.f32.mrf.mxu0 }
 0x2eb   : > { %v1920_v1 = vpack.c.bf16 %v1608_v48, %v1605_v61  ;;  %v1600_v3 = vadd.f32 %v1855_v24, %v1599_v50 }
 0x2ed   : > { %1944 = vst [vmem:[%s2884_s14 + $0x18] sm:$0xff] %v1920_v1   ;;  %v1915_v55 = vpack.c.bf16 %v1600_v3, %v1597_v51 }
 0x2ef   : > { %1943 = vst [vmem:[%s2884_s14 + $0x10] sm:$0xff] %v1915_v55  }
 0x2f4   : > { %v2246_v58 = vpop.f32.mrf.mxu0 }
 0x2f5   : > { %v1621_v27 = vadd.f32 %v2246_v58, %v1855_v24 }
 0x2f6   : > { %v1612_v53 = vpop.f32.mrf.mxu0 }
 0x2f7   : > { %v1613_v60 = vadd.f32 %v1855_v24, %v1612_v53 }
 0x2f8   : > { %v2247_v5 = vpop.f32.mrf.mxu0 }
 0x2f9   : > { %v1624_v23 = vadd.f32 %v2247_v5, %v1855_v24 }
 0x2fa   : > { %v1615_v25 = vpop.f32.mrf.mxu0 }
 0x2fb   : > { %v1930_v63 = vpack.c.bf16 %v1624_v23, %v1621_v27  ;;  %v1616_v19 = vadd.f32 %v1855_v24, %v1615_v25 }
 0x2fc   : > { %v2250_v21 = vpop.f32.mrf.mxu0 }
 0x2fd   : > { %1946 = vst [vmem:[%s2884_s14 + $0x28] sm:$0xff] %v1930_v63   ;;  %v1925_v28 = vpack.c.bf16 %v1616_v19, %v1613_v60  ;;  %v1637_v11 = vadd.f32 %v2250_v21, %v1855_v24 }
 0x2fe   : > { %v1628_v31 = vpop.f32.mrf.mxu0 }
 0x2ff   : > { %1945 = vst [vmem:[%s2884_s14 + $0x20] sm:$0xff] %v1925_v28   ;;  %v1629_v15 = vadd.f32 %v1855_v24, %v1628_v31 }
 0x300   : > { %v2251_v9 = vpop.f32.mrf.mxu0 }
 0x301   : > { %v1640_v13 = vadd.f32 %v2251_v9, %v1855_v24 }
 0x302   : > { %v1631_v16 = vpop.f32.mrf.mxu0 }
 0x303   : > { %v1940_v17 = vpack.c.bf16 %v1640_v13, %v1637_v11  ;;  %v1632_v14 = vadd.f32 %v1855_v24, %v1631_v16 }
 0x305   : > { %1948 = vst [vmem:[%s2884_s14 + $0x38] sm:$0xff] %v1940_v17   ;;  %v1935_v30 = vpack.c.bf16 %v1632_v14, %v1629_v15 }
 0x307   : > { %1947 = vst [vmem:[%s2884_s14 + $0x30] sm:$0xff] %v1935_v30  }
 0x308 PF: > { %s17_s24 = sadd.s32 1, %s2344_s24  }
 0x309   : > { %p14_p4 = scmp.ge.s32.totalorder %s17_s24, 4  }
 0x30b   :  { %16 = sbr.rel (!%p14_p4) target bundleno = 1 (0x1), region = 78 }

</bundles_post_ra>
